<compile_context>
chip_gen: v6e
topology: v6e:2x2x1
jax: 0.10.0
libtpu: 0.0.40
codegen_flags: <defaults>
</compile_context>

<pallas_src>
import functools

import numpy as np
import jax
import jax.numpy as jnp
from jax.experimental import pallas as pl
from jax.experimental.pallas import tpu as pltpu


def _round_up(n, m):
    return ((n + m - 1) // m) * m


# ---------------------------------------------------------------------------
# constant tables (tiny, built outside the kernel)
# ---------------------------------------------------------------------------
def _build_tables(num_freqs, min_freq_log2, max_freq_log2, alpha, num_channels,
                  scale, use_identity, pack):
    """Block-diag replication matrix (K*C, K*D_out) and per-column tables (3, K*D_out).

    Feature column j corresponds to (freq f, phase s, channel c) with
    j = f*(2*C) + s*C + c   (torch stack(dim=-2) + flatten(start_dim=-3));
    the easing window is *tiled* along the feature dim (torch `.repeat(1,1,D//F)`),
    i.e. window index is j % F.  Identity columns (if any) come first.
    """
    F, C, K = num_freqs, num_channels, pack
    if max_freq_log2 is None:
        max_freq_log2 = num_freqs - 1.0
    D = 2 * F * C
    off = C if use_identity else 0
    D_out = off + D

    bands_np = np.linspace(min_freq_log2, max_freq_log2, F, dtype=np.float32)
    freqs_np = (2.0 ** bands_np).astype(np.float32)
    j = np.arange(D)

    # replication/scale matrix: out col (off+j) <- channel (j % C) * scale*freq
    r = np.zeros((C, D_out), np.float32)
    if use_identity:
        r[np.arange(C), np.arange(C)] = 1.0
    r[j % C, off + j] = (scale * freqs_np[j // (2 * C)]).astype(np.float32)
    r_packed = np.kron(np.eye(K, dtype=np.float32), r)          # (K*C, K*D_out)

    # per-column phase / easing-window / identity-mask.  alpha may be a traced
    # value, so the window is built with jnp.
    bands = jnp.asarray(bands_np)
    eased = jnp.clip(alpha - bands, 0.0, 1.0)
    window = 0.5 * (1.0 + jnp.cos(jnp.pi * eased + jnp.pi))      # (F,)
    phase_feat = jnp.asarray(((j // C) % 2).astype(np.float32) * (np.pi / 2.0))
    win_feat = window[j % F]
    if use_identity:
        ones_c = jnp.ones((C,), jnp.float32)
        zeros_c = jnp.zeros((C,), jnp.float32)
        phase_col = jnp.concatenate([zeros_c, phase_feat])
        win_col = jnp.concatenate([ones_c, win_feat])
        id_col = jnp.concatenate([ones_c, jnp.zeros((D,), jnp.float32)])
    else:
        phase_col, win_col = phase_feat, win_feat
        id_col = jnp.zeros((D,), jnp.float32)
    tab = jnp.stack([phase_col, win_col, id_col], axis=0)        # (3, D_out)
    tab = jnp.tile(tab, (1, K)).astype(jnp.float32)              # (3, K*D_out)
    return jnp.asarray(r_packed), tab, D_out


# ---------------------------------------------------------------------------
# Pallas kernel: one MXU matmul + elementwise sin/window/select on a row tile
# ---------------------------------------------------------------------------
def _annealed_sin_kernel(use_identity, x_ref, r_ref, tab_ref, o_ref):
    # x_ref:   (TM, K*C)     packed input rows
    # r_ref:   (K*C, K*D)    block-diagonal replication / scale*freq matrix
    # tab_ref: (3,  K*D)     [phase; easing window; identity mask]
    # o_ref:   (TM, K*D)
    x = x_ref[...]
    # One MXU matmul performs the 2F-fold channel replication, the scale*freq
    # multiply and the identity passthrough.  HIGHEST precision keeps the f32
    # angles exact (freqs are powers of two); the MXU slot is otherwise idle so
    # this work is off the VPU critical path.
    angles = jax.lax.dot_general(
        x, r_ref[...],
        dimension_numbers=(((1,), (0,)), ((), ())),
        precision=jax.lax.Precision.HIGHEST,
        preferred_element_type=jnp.float32)                      # (TM, K*D)
    phase = tab_ref[0:1, :]
    win = tab_ref[1:2, :]
    out = jnp.sin(angles + phase) * win
    if use_identity:
        out = jnp.where(tab_ref[2:3, :] > 0.5, angles, out)
    o_ref[...] = out.astype(o_ref.dtype)                         # one aligned store


def annealed_sinusoidal_encode(x, alpha, *, num_freqs, min_freq_log2=0.0,
                               max_freq_log2=None, scale=1.0, use_identity=True,
                               rows_per_step=8192, pack=8, out_dtype=None):
    if num_freqs == 0:
        return x
    batch_shape = x.shape[:-1]
    C = x.shape[-1]
    N = int(np.prod(batch_shape)) if batch_shape else 1
    if out_dtype is None:
        # torch promotes x against the f32 freq bands; pass out_dtype=jnp.bfloat16
        # to halve HBM write traffic if downstream tolerates it (v5e win).
        out_dtype = jnp.promote_types(x.dtype, jnp.float32)

    D_out_full = (C if use_identity else 0) + 2 * num_freqs * C
    # Lane-pack K logical rows per block row only when a single row is lane-sparse.
    K = 1 if D_out_full >= 128 else pack
    while K * D_out_full < 128 and K < 512:
        K *= 2

    r_packed, tab, D_out = _build_tables(
        num_freqs, min_freq_log2, max_freq_log2, alpha, C, scale, use_identity, K)

    x_flat = x.reshape(N, C).astype(jnp.float32)

    # Packed-row tiling: ~rows_per_step logical rows per grid step, output block
    # capped at ~4 MiB so double-buffered in+out stays well under the 32 MiB
    # scoped-VMEM default (v7x has only 64 MiB physical VMEM).
    M = _round_up(N, K) // K
    tm_cap_vmem = max(8, (4 * 1024 * 1024) // (K * D_out * 4))
    TM = min(max(rows_per_step // K, 8), tm_cap_vmem, _round_up(M, 8))
    TM = max(8, (TM // 8) * 8)
    M_pad = _round_up(M, TM)
    N_total = M_pad * K
    if N_total != N:
        # padded rows compute garbage that is sliced off below
        x_flat = jnp.pad(x_flat, ((0, N_total - N), (0, 0)))
    x_packed = x_flat.reshape(M_pad, K * C)

    kernel = functools.partial(_annealed_sin_kernel, use_identity)
    out = pl.pallas_call(
        kernel,
        out_shape=jax.ShapeDtypeStruct((M_pad, K * D_out), out_dtype),
        grid=(M_pad // TM,),
        in_specs=[
            pl.BlockSpec((TM, K * C), lambda i: (i, 0)),
            pl.BlockSpec((K * C, K * D_out), lambda i: (0, 0)),   # resident
            pl.BlockSpec((3, K * D_out), lambda i: (0, 0)),       # resident
        ],
        out_specs=pl.BlockSpec((TM, K * D_out), lambda i: (i, 0)),
        compiler_params=pltpu.CompilerParams(
            dimension_semantics=("parallel",),   # megacore / v7x 2-TC sharding
            vmem_limit_bytes=32 * 1024 * 1024),
    )(x_packed, r_packed, tab)

    out = out.reshape(N_total, D_out)
    if N_total != N:
        out = out[:N]
    return out.reshape(batch_shape + (D_out,))


# ---------------------------------------------------------------------------
# pure-JAX reference (mirrors the PyTorch forward exactly)
# ---------------------------------------------------------------------------
def reference(x, alpha, *, num_freqs, min_freq_log2=0.0, max_freq_log2=None,
              scale=1.0, use_identity=True):
    if num_freqs == 0:
        return x
    F = num_freqs
    mf = (num_freqs - 1.0) if max_freq_log2 is None else max_freq_log2
    bands = jnp.linspace(min_freq_log2, mf, F)
    freqs = 2.0 ** bands                                                # (F,)
    xe = x[..., None, :]                                                # (...,1,C)
    angles = scale * xe * freqs[:, None]                                # (...,F,C)
    feats = jnp.stack([angles, angles + jnp.pi / 2], axis=-2)           # (...,F,2,C)
    feats = feats.reshape(feats.shape[:-3] + (-1,))                     # (...,2FC)
    feats = jnp.sin(feats)
    window = 0.5 * (1.0 + jnp.cos(jnp.pi * jnp.clip(alpha - bands, 0.0, 1.0) + jnp.pi))
    win_tiled = jnp.tile(window, feats.shape[-1] // F)                  # repeat semantics
    feats = feats * win_tiled
    if use_identity:
        return jnp.concatenate([x, feats], axis=-1)
    return feats


if __name__ == "__main__":
    num_freqs = 8
    alpha = 4.5

    key0, key1 = jax.random.split(jax.random.PRNGKey(0))

    # config 1: with identity, tiny batch (batch=2, seq=8, channels=3)
    x1 = jax.random.normal(key0, (2, 8, 3), dtype=jnp.float32)
    out1 = annealed_sinusoidal_encode(x1, alpha, num_freqs=num_freqs, use_identity=True)
    out1 = jax.block_until_ready(out1)
    ref1 = reference(x1, alpha, num_freqs=num_freqs, use_identity=True)
    assert out1.shape == (2, 8, 3 + 2 * num_freqs * 3), out1.shape
    np.testing.assert_allclose(np.asarray(out1), np.asarray(ref1), rtol=1e-4, atol=1e-4)

    # config 2: no identity, row count not a multiple of the pack factor
    # (exercises row padding; K*D_out = 384 is fully lane-dense)
    x2 = jax.random.normal(key1, (4, 13, 3), dtype=jnp.float32)
    out2 = annealed_sinusoidal_encode(x2, 2.3, num_freqs=num_freqs, use_identity=False)
    out2 = jax.block_until_ready(out2)
    ref2 = reference(x2, 2.3, num_freqs=num_freqs, use_identity=False)
    assert out2.shape == (4, 13, 2 * num_freqs * 3), out2.shape
    np.testing.assert_allclose(np.asarray(out2), np.asarray(ref2), rtol=1e-4, atol=1e-4)

    print("KERNEL_OK")
</pallas_src>

<mosaic_0001>
module attributes {stable_mosaic.version = 11 : i64} {
  func.func @_annealed_sin_kernel(%arg0: i32, %arg1: memref<8x24xf32, #tpu.memory_space<vmem>>, %arg2: memref<24x408xf32, #tpu.memory_space<vmem>>, %arg3: memref<3x408xf32, #tpu.memory_space<vmem>>, %arg4: memref<8x408xf32, #tpu.memory_space<vmem>>) attributes {dimension_semantics = [#tpu.dimension_semantics<parallel>], iteration_bounds = array<i64: 1>, scalar_prefetch = 0 : i64, scratch_operands = 0 : i64, tpu.core_type = #tpu.core_type<tc>, window_params = [{transform_indices = @transform_0, window_bounds = array<i64: 8, 24>}, {pipeline_mode = #tpu.pipeline_mode<synchronous>, transform_indices = @transform_1, window_bounds = array<i64: 24, 408>}, {pipeline_mode = #tpu.pipeline_mode<synchronous>, transform_indices = @transform_2, window_bounds = array<i64: 3, 408>}, {transform_indices = @transform_3, window_bounds = array<i64: 8, 408>}]} {
    %c0 = arith.constant 0 : index
    %c0_0 = arith.constant 0 : index
    %0 = vector.load %arg1[%c0, %c0_0] : memref<8x24xf32, #tpu.memory_space<vmem>>, vector<8x24xf32>
    %c0_1 = arith.constant 0 : index
    %c0_2 = arith.constant 0 : index
    %1 = vector.load %arg2[%c0_1, %c0_2] : memref<24x408xf32, #tpu.memory_space<vmem>>, vector<24x408xf32>
    %cst = arith.constant dense<0.000000e+00> : vector<8x408xf32>
    %2 = tpu.matmul %0, %1, %cst {dimension_numbers = #tpu.dot_dimension_numbers<[1], [0], [0], [1], [0, 0, 1, 1], [], []>, precision = #tpu.contract_precision<fp32>} : vector<8x24xf32>, vector<24x408xf32>, vector<8x408xf32> -> vector<8x408xf32>
    %c0_3 = arith.constant 0 : index
    %c0_4 = arith.constant 0 : index
    %3 = vector.load %arg3[%c0_3, %c0_4] : memref<3x408xf32, #tpu.memory_space<vmem>>, vector<1x408xf32>
    %c1 = arith.constant 1 : index
    %c0_5 = arith.constant 0 : index
    %4 = vector.load %arg3[%c1, %c0_5] : memref<3x408xf32, #tpu.memory_space<vmem>>, vector<1x408xf32>
    %5 = vector.broadcast %3 : vector<1x408xf32> to vector<8x408xf32>
    %6 = arith.addf %2, %5 : vector<8x408xf32>
    %7 = math.sin %6 : vector<8x408xf32>
    %8 = vector.broadcast %4 : vector<1x408xf32> to vector<8x408xf32>
    %9 = arith.mulf %7, %8 : vector<8x408xf32>
    %c2 = arith.constant 2 : index
    %c0_6 = arith.constant 0 : index
    %10 = vector.load %arg3[%c2, %c0_6] : memref<3x408xf32, #tpu.memory_space<vmem>>, vector<1x408xf32>
    %cst_7 = arith.constant 5.000000e-01 : f32
    %11 = vector.broadcast %cst_7 : f32 to vector<1x408xf32>
    %12 = arith.cmpf ogt, %10, %11 : vector<1x408xf32>
    %13 = vector.shape_cast %12 : vector<1x408xi1> to vector<1x408xi1>
    %14 = vector.broadcast %13 : vector<1x408xi1> to vector<8x408xi1>
    %15 = arith.select %14, %2, %9 : vector<8x408xi1>, vector<8x408xf32>
    %c0_8 = arith.constant 0 : index
    %c0_9 = arith.constant 0 : index
    %16 = vector.load %arg4[%c0_8, %c0_9] : memref<8x408xf32, #tpu.memory_space<vmem>>, vector<8x408xf32>
    tpu.vector_store %arg4[%c0_8, %c0_9], %15 {strides = array<i32>} : memref<8x408xf32, #tpu.memory_space<vmem>>, vector<8x408xf32>,
    return
  }
  func.func @transform_0(%arg0: i32) -> (i32, i32) {
    %c0_i32 = arith.constant 0 : i32
    %c0_i32_0 = arith.constant 0 : i32
    return %arg0, %c0_i32 : i32, i32
  }
  func.func @transform_1(%arg0: i32) -> (i32, i32) {
    %c0_i32 = arith.constant 0 : i32
    %c0_i32_0 = arith.constant 0 : i32
    %c0_i32_1 = arith.constant 0 : i32
    return %c0_i32, %c0_i32_0 : i32, i32
  }
  func.func @transform_2(%arg0: i32) -> (i32, i32) {
    %c0_i32 = arith.constant 0 : i32
    %c0_i32_0 = arith.constant 0 : i32
    %c0_i32_1 = arith.constant 0 : i32
    return %c0_i32, %c0_i32_0 : i32, i32
  }
  func.func @transform_3(%arg0: i32) -> (i32, i32) {
    %c0_i32 = arith.constant 0 : i32
    %c0_i32_0 = arith.constant 0 : i32
    return %arg0, %c0_i32 : i32, i32
  }
}

</mosaic_0001>

<bundles_post_ra>
// kernel: tpu_custom_call.1
= control target key start
LH: loop header
LB: loop body
LE: loop exit
PB: predicated region body
PF: predicated region fallthrough
CT: control target
= control target key end

     0   :  { %8 = vsyncpa [#allocation3], 0  ;;  %s2340_s0 = inlined_call_operand.hbm [shape: f32[8,24], index: 0, kind: input, shape index: {}]   ;;  %s2341_s1 = inlined_call_operand.hbm [shape: f32[24,408], index: 1, kind: input, shape index: {}]   ;;  %s2342_s2 = inlined_call_operand.hbm [shape: f32[3,408], index: 2, kind: input, shape index: {}]   ;;  %s2343_s3 = inlined_call_operand.hbm [shape: f32[8,408], index: 3, kind: output, shape index: {}]  }
   0x1   :  { %9 = vsyncpa [#allocation6], 0 }
   0x2   :  { %10 = vsyncpa [#allocation4], 0  ;;  %s1768_s12 = smov [#allocation5]  }
   0x3   :  { %s26_s13 = sshll.u32 %s1768_s12, 4  ;;  %s27_s13 = int_to_ptr.vmem [resolvable:$true] %s26_s13 }
   0x4   :  { %s1690_s14 = scalar_lea.vmem %s27_s13, 1536  ;;  %p1695_p1 = scmp.lt.s32.totalorder %s27_s13, %s27_s13 }
   0x5   :  { %p1691_p0 = scmp.ne.s32.totalorder %s27_s13, %s1690_s14  ;;  %p1696_p2 = scmp.lt.s32.totalorder %s1690_s14, %s1690_s14 }
   0x7   :  { %p1697_p3 = por %p1696_p2, %p1695_p1 }
   0x9   :  { %p1698_p4 = pnand %p1697_p3, %p1691_p0 }
   0xb   :  { %1701 = shalt.err (!%p1698_p4)
}
   0xc   :  { %s1769_s15 = smov 512   ;;  %s1770_s16 = smov 32  }
   0xd   :  { %32 = dma.hbm_to_vmem [thread:$0]  %s2341_s1, 1536, %s27_s13, [#allocation6], %s1769_s15, %s1769_s15, %s1770_s16  }
   0xe   :  { %s1771_s19 = smov [#allocation2]   ;;  %s1772_s21 = smov [#allocation7]  }
   0xf   :  { %s17_s20 = sshll.u32 %s1771_s19, 4  ;;  %s39_s22 = sshll.u32 %s1772_s21, 4  ;;  %s18_s20 = int_to_ptr.vmem [resolvable:$true] %s17_s20  ;;  %s40_s22 = int_to_ptr.vmem [resolvable:$true] %s39_s22 }
  0x10   :  { %s1710_s23 = scalar_lea.vmem %s18_s20, 128  ;;  %p1715_p6 = scmp.lt.s32.totalorder %s18_s20, %s18_s20 }
  0x11   :  { %p1711_p5 = scmp.ne.s32.totalorder %s18_s20, %s1710_s23  ;;  %p1716_p7 = scmp.lt.s32.totalorder %s1710_s23, %s1710_s23 }
  0x13   :  { %p1717_p8 = por %p1716_p7, %p1715_p6 }
  0x15   :  { %p1718_p9 = pnand %p1717_p8, %p1711_p5 }
  0x17   :  { %1721 = shalt.err (!%p1718_p9)
}
  0x18   :  { %20 = dma.hbm_to_vmem [thread:$0]  %s2340_s0, 128, %s18_s20, [#allocation3]  }
  0x19   :  { %s1730_s26 = scalar_lea.vmem %s40_s22, 256  ;;  %p1735_p11 = scmp.lt.s32.totalorder %s40_s22, %s40_s22 }
  0x1a   :  { %p1731_p10 = scmp.ne.s32.totalorder %s40_s22, %s1730_s26  ;;  %p1736_p12 = scmp.lt.s32.totalorder %s1730_s26, %s1730_s26 }
  0x1c   :  { %p1737_p13 = por %p1736_p12, %p1735_p11 }
  0x1e   :  { %p1738_p0 = pnand %p1737_p13, %p1731_p10 }
  0x20   :  { %1741 = shalt.err (!%p1738_p0)
}
  0x21   :  { %42 = dma.hbm_to_vmem [thread:$0]  %s2342_s2, 256, %s40_s22, [#allocation6]  }
  0x22   :  { %1762 = dma.done.wait [#allocation3], 128  }
  0x23   :  { %1763 = vsyncadd [#allocation3], 4294967168 }
  0x24   :  { %1764 = dma.done.wait [#allocation6], 1792  }
  0x25   :  { %1765 = vsyncadd [#allocation6], 4294965504  ;;  %v1773_v0 = vmov 0.0   ;;  %v62_v1 = vld [vmem:[#allocation5 + $0x48] sm:$0xff]  ;;  %v61_v2 = vld [vmem:[#allocation5 + $0x40] sm:$0xff]  ;;  %vm65_vm0 = vcmask 195584  }
  0x26   :  { %139 = vmatprep.mubr.f32.mxu0 %v1773_v0  ;;  %245 = vmatprep.mubr.f32.mxu1 %v1773_v0  ;;  %v58_v3 = vld [vmem:[#allocation5 + $0x28] sm:$0xff]  ;;  %v1813_v4 = vand.u32 4294901760, %v62_v1  ;;  %v1815_v5 = vand.u32 4294901760, %v61_v2  ;;  %v57_v7 = vld [vmem:[#allocation5 + $0x20] sm:$0xff]  ;;  %v52_v13 = vld [vmem:[#allocation2] sm:$0xff]  ;;  %s1781_s0 = smov [#allocation8]  }
  0x27   :  { %v1817_v6 = vand.u32 4294901760, %v58_v3  ;;  %v54_v8 = vld [vmem:[#allocation5 + $0x8] sm:$0xff]  ;;  %v53_v9 = vld [vmem:[#allocation5] sm:$0xff]  ;;  %v1819_v10 = vand.u32 4294901760, %v57_v7  ;;  %v67_v17 = vsel %vm65_vm0, %v52_v13, 0  ;;  %v64_v42 = vld [vmem:[#allocation5 + $0x58] sm:$0xff] }
  0x28   :  { %v1821_v11 = vand.u32 4294901760, %v54_v8  ;;  %v1823_v12 = vand.u32 4294901760, %v53_v9  ;;  %96 = vmatprep.subr.mxu0 %v1813_v4  ;;  %v1827_v14 = vsub.f32 %v62_v1, %v1813_v4  ;;  %v1830_v15 = vsub.f32 %v61_v2, %v1815_v5  ;;  %v63_v45 = vld [vmem:[#allocation5 + $0x50] sm:$0xff]  ;;  %v60_v46 = vld [vmem:[#allocation5 + $0x38] sm:$0xff]  ;;  %s1610_s2 = sshll.u32 %s1781_s0, 4  ;;  %s1611_s2 = int_to_ptr.vmem [resolvable:$true] %s1610_s2 }
  0x29   :  { %v1833_v16 = vsub.f32 %v58_v3, %v1817_v6  ;;  %98 = vmatpush1.msra.mxu0 %v1815_v5  ;;  %v1837_v18 = vand.u32 4294901760, %v67_v17  ;;  %v1840_v19 = vsub.f32 %v57_v7, %v1819_v10  ;;  %v1882_v47 = vand.u32 4294901760, %v64_v42  ;;  %v59_v49 = vld [vmem:[#allocation5 + $0x30] sm:$0xff]  ;;  %v56_v51 = vld [vmem:[#allocation5 + $0x18] sm:$0xff]  ;;  %s1742_s28 = scalar_lea.vmem %s1611_s2, 512  ;;  %p1747_p2 = scmp.lt.s32.totalorder %s1611_s2, %s1611_s2 }
  0x2a   :  { %v1843_v20 = vsub.f32 %v54_v8, %v1821_v11  ;;  %v1846_v21 = vsub.f32 %v53_v9, %v1823_v12  ;;  %100 = vmatprep.subr.mxu0 %v1817_v6  ;;  %v179_v22 = vand.u32 4294901760, %v1827_v14  ;;  %v185_v23 = vand.u32 4294901760, %v1830_v15  ;;  %v55_v52 = vld [vmem:[#allocation5 + $0x10] sm:$0xff]  ;;  %p1743_p1 = scmp.ne.s32.totalorder %s1611_s2, %s1742_s28  ;;  %p1748_p3 = scmp.lt.s32.totalorder %s1742_s28, %s1742_s28 }
  0x2b   :  { %v191_v24 = vand.u32 4294901760, %v1833_v16  ;;  %102 = vmatpush1.msra.mxu0 %v1819_v10  ;;  %v1854_v25 = vsub.f32 %v67_v17, %v1837_v18  ;;  %v197_v26 = vand.u32 4294901760, %v1840_v19  ;;  %v1885_v48 = vand.u32 4294901760, %v63_v45 }
  0x2c   :  { %v203_v27 = vand.u32 4294901760, %v1843_v20  ;;  %v209_v28 = vand.u32 4294901760, %v1846_v21  ;;  %104 = vmatprep.subr.mxu0 %v1821_v11  ;;  %v180_v29 = vsub.f32 %v1827_v14, %v179_v22  ;;  %v186_v30 = vsub.f32 %v1830_v15, %v185_v23  ;;  %p1749_p4 = por %p1748_p3, %p1747_p2 }
  0x2d   :  { %v192_v31 = vsub.f32 %v1833_v16, %v191_v24  ;;  %106 = vmatpush1.msra.mxu0 %v1823_v12  ;;  %v1865_v32 = vand.u32 4294901760, %v1854_v25  ;;  %v198_v33 = vsub.f32 %v1840_v19, %v197_v26  ;;  %v1888_v50 = vand.u32 4294901760, %v60_v46 }
  0x2e   :  { %v204_v34 = vsub.f32 %v1843_v20, %v203_v27  ;;  %v210_v35 = vsub.f32 %v1846_v21, %v209_v28  ;;  %v181_v36 = vand.u32 4294901760, %v180_v29  ;;  %v187_v37 = vand.u32 4294901760, %v186_v30  ;;  %281 = vmatprep.subr.mxu0 %v1827_v14  ;;  %p1750_p5 = pnand %p1749_p4, %p1743_p1 }
  0x2f   :  { %v193_v38 = vand.u32 4294901760, %v192_v31  ;;  %v143_v39 = vsub.f32 %v1854_v25, %v1865_v32  ;;  %v199_v40 = vand.u32 4294901760, %v198_v33  ;;  %v1894_v53 = vand.u32 4294901760, %v59_v49 }
  0x30   :  { %182 = vmatprep.subr.mxu1 %v181_v36  ;;  %v205_v41 = vand.u32 4294901760, %v204_v34  ;;  %v211_v44 = vand.u32 4294901760, %v210_v35  ;;  %v1897_v54 = vsub.f32 %v64_v42, %v1882_v47  ;;  %v1902_v55 = vsub.f32 %v63_v45, %v1885_v48 }
  0x31   :  { %188 = vmatpush1.msra.mxu1 %v187_v37  ;;  %v1879_v43 = vand.u32 4294901760, %v143_v39  ;;  %v1904_v56 = vand.u32 4294901760, %v56_v51  ;;  %v1908_v57 = vand.u32 4294901760, %v55_v52  ;;  %v1911_v58 = vsub.f32 %v60_v46, %v1888_v50 }
  0x32   :  { %194 = vmatprep.subr.mxu1 %v193_v38  ;;  %v1916_v59 = vsub.f32 %v59_v49, %v1894_v53  ;;  %v696_v60 = vand.u32 4294901760, %v1897_v54  ;;  %v702_v61 = vand.u32 4294901760, %v1902_v55 }
  0x33   :  { %145 = vmatmul.mubr.f32.vlgmr.msra.gmra.mxu0 %v1879_v43  ;;  %200 = vmatpush1.msra.mxu1 %v199_v40  ;;  %v1922_v62 = vsub.f32 %v56_v51, %v1904_v56  ;;  %v1927_v63 = vsub.f32 %v55_v52, %v1908_v57  ;;  %v708_v1 = vand.u32 4294901760, %v1911_v58 }
  0x34   :  { %284 = vmatpush1.msra.mxu0 %v1830_v15  ;;  %206 = vmatprep.subr.mxu1 %v205_v41  ;;  %v697_v2 = vsub.f32 %v1897_v54, %v696_v60  ;;  %v714_v3 = vand.u32 4294901760, %v1916_v59  ;;  %v703_v7 = vsub.f32 %v1902_v55, %v702_v61 }
  0x35   :  { %287 = vmatprep.subr.mxu0 %v1833_v16  ;;  %212 = vmatpush1.msra.mxu1 %v211_v44  ;;  %v720_v8 = vand.u32 4294901760, %v1922_v62  ;;  %v726_v9 = vand.u32 4294901760, %v1927_v63 }
  0x36   :  { %290 = vmatpush1.msra.mxu0 %v1840_v19  ;;  %247 = vmatmul.mubr.f32.vlgmr.msra.gmra.mxu1 %v1837_v18  ;;  %v698_v13 = vand.u32 4294901760, %v697_v2  ;;  %v715_v14 = vsub.f32 %v1916_v59, %v714_v3 }
  0x37   :  { %293 = vmatprep.subr.mxu0 %v1843_v20  ;;  %365 = vmatprep.subr.mxu1 %v1813_v4  ;;  %v721_v15 = vsub.f32 %v1922_v62, %v720_v8  ;;  %v727_v16 = vsub.f32 %v1927_v63, %v726_v9 }
  0x38   :  { %296 = vmatpush1.msra.mxu0 %v1846_v21  ;;  %329 = vmatprep.mubr.f32.mxu0 %v1773_v0  ;;  %v1107_v21 = vlaneseq }
  0x39   :  { %367 = vmatpush1.msra.mxu1 %v1815_v5  ;;  %332 = vmatmul.mubr.f32.vlgmr.msra.gmra.mxu0 %v1854_v25 }
  0x3a   :  { %369 = vmatprep.subr.mxu1 %v1817_v6  ;;  %447 = vmatprep.subr.mxu0 %v179_v22 }
  0x3b   :  { %371 = vmatpush1.msra.mxu1 %v1819_v10  ;;  %451 = vmatpush1.msra.mxu0 %v185_v23 }
  0x3c   :  { %373 = vmatprep.subr.mxu1 %v1821_v11  ;;  %455 = vmatprep.subr.mxu0 %v191_v24 }
  0x3d   :  { %375 = vmatpush1.msra.mxu1 %v1823_v12  ;;  %408 = vmatprep.mubr.f32.mxu1 %v1773_v0 }
  0x3e   :  { %459 = vmatpush1.msra.mxu0 %v197_v26  ;;  %412 = vmatmul.mubr.f32.vlgmr.msra.gmra.mxu1 %v1865_v32  ;;  %v2000_v26 = vshrl.u32 %v1107_v21, 7 }
  0x3f   :  { %463 = vmatprep.subr.mxu0 %v203_v27  ;;  %535 = vmatprep.subr.mxu1 %v1813_v4  ;;  %v709_v4 = vsub.f32 %v1911_v58, %v708_v1 }
  0x40   :  { %467 = vmatpush1.msra.mxu0 %v209_v28  ;;  %500 = vmatprep.mubr.f32.mxu0 %v1773_v0  ;;  %v2003_v33 = vsub.s32 0, %v2000_v26  ;;  %v2008_v36 = vsub.s32 1, %v2000_v26 }
  0x41   :  { %537 = vmatpush1.msra.mxu1 %v1815_v5  ;;  %502 = vmatmul.mubr.f32.vlgmr.msra.gmra.mxu0 %v1837_v18  ;;  %v704_v5 = vand.u32 4294901760, %v703_v7 }
  0x42   :  { %539 = vmatprep.subr.mxu1 %v1817_v6  ;;  %613 = vmatprep.subr.mxu0 %v1882_v47  ;;  %v710_v6 = vand.u32 4294901760, %v709_v4 }
  0x43   :  { %541 = vmatpush1.msra.mxu1 %v1819_v10  ;;  %615 = vmatpush1.msra.mxu0 %v1885_v48  ;;  %v716_v10 = vand.u32 4294901760, %v715_v14 }
  0x44   :  { %543 = vmatprep.subr.mxu1 %v1821_v11  ;;  %617 = vmatprep.subr.mxu0 %v1888_v50  ;;  %v722_v11 = vand.u32 4294901760, %v721_v15 }
  0x45   :  { %545 = vmatpush1.msra.mxu1 %v1823_v12  ;;  %578 = vmatprep.mubr.f32.mxu1 %v1773_v0  ;;  %v728_v12 = vand.u32 4294901760, %v727_v16  ;;  %v1774_v16 = vmov 683565275  }
  0x46   :  { %619 = vmatpush1.msra.mxu0 %v1894_v53  ;;  %580 = vmatmul.mubr.f32.vlgmr.msra.gmra.mxu1 %v1837_v18 }
  0x47   :  { %621 = vmatprep.subr.mxu0 %v1904_v56  ;;  %699 = vmatprep.subr.mxu1 %v698_v13 }
  0x48   :  { %623 = vmatpush1.msra.mxu0 %v1908_v57  ;;  %705 = vmatpush1.msra.mxu1 %v704_v5 }
  0x49   :  { %656 = vmatprep.mubr.f32.mxu0 %v1773_v0  ;;  %711 = vmatprep.subr.mxu1 %v710_v6 }
  0x4a   :  { %798 = vmatprep.subr.mxu0 %v1897_v54  ;;  %662 = vmatmul.mubr.f32.vlgmr.msra.gmra.mxu0 %v1879_v43 }
  0x4b   :  { %717 = vmatpush1.msra.mxu1 %v716_v10  ;;  %801 = vmatpush1.msra.mxu0 %v1902_v55 }
  0x4c   :  { %723 = vmatprep.subr.mxu1 %v722_v11  ;;  %804 = vmatprep.subr.mxu0 %v1911_v58  ;;  %v1775_v11 = vmov 2475754826  }
  0x4d   :  { %729 = vmatpush1.msra.mxu1 %v728_v12  ;;  %762 = vmatprep.mubr.f32.mxu1 %v1773_v0 }
  0x4e   :  { %807 = vmatpush1.msra.mxu0 %v1916_v59  ;;  %764 = vmatmul.mubr.f32.vlgmr.msra.gmra.mxu1 %v1837_v18 }
  0x4f   :  { %810 = vmatprep.subr.mxu0 %v1922_v62  ;;  %882 = vmatprep.subr.mxu1 %v1882_v47 }
  0x50   :  { %813 = vmatpush1.msra.mxu0 %v1927_v63  ;;  %846 = vmatprep.mubr.f32.mxu0 %v1773_v0 }
  0x51   :  { %884 = vmatpush1.msra.mxu1 %v1885_v48  ;;  %849 = vmatmul.mubr.f32.vlgmr.msra.gmra.mxu0 %v1854_v25 }
  0x52   :  { %886 = vmatprep.subr.mxu1 %v1888_v50  ;;  %964 = vmatprep.subr.mxu0 %v696_v60 }
  0x53   :  { %888 = vmatpush1.msra.mxu1 %v1894_v53  ;;  %968 = vmatpush1.msra.mxu0 %v702_v61 }
  0x54   :  { %890 = vmatprep.subr.mxu1 %v1904_v56  ;;  %972 = vmatprep.subr.mxu0 %v708_v1 }
  0x55   :  { %892 = vmatpush1.msra.mxu1 %v1908_v57  ;;  %925 = vmatprep.mubr.f32.mxu1 %v1773_v0 }
  0x56   :  { %976 = vmatpush1.msra.mxu0 %v714_v3  ;;  %929 = vmatmul.mubr.f32.vlgmr.msra.gmra.mxu1 %v1865_v32 }
  0x57   :  { %980 = vmatprep.subr.mxu0 %v720_v8  ;;  %1052 = vmatprep.subr.mxu1 %v1882_v47 }
  0x58   :  { %984 = vmatpush1.msra.mxu0 %v726_v9  ;;  %1017 = vmatprep.mubr.f32.mxu0 %v1773_v0  ;;  %v2033_v9 = vsub.s32 2, %v2000_v26 }
  0x59   :  { %1054 = vmatpush1.msra.mxu1 %v1885_v48  ;;  %1019 = vmatmul.mubr.f32.vlgmr.msra.gmra.mxu0 %v1837_v18 }
  0x5a   :  { %1056 = vmatprep.subr.mxu1 %v1888_v50  ;;  %1095 = vmatprep.mubr.f32.mxu1 %v1773_v0 }
  0x5b   :  { %1058 = vmatpush1.msra.mxu1 %v1894_v53 }
  0x5c   :  { %1060 = vmatprep.subr.mxu1 %v1904_v56 }
  0x5d   :  { %1062 = vmatpush1.msra.mxu1 %v1908_v57 }
  0x5e   :  { %1097 = vmatmul.mubr.f32.vlgmr.msra.gmra.mxu1 %v1837_v18  ;;  %v2005_v18 = vld [vmem:[#allocation7] ss:$4 sm:$0xf] }
  0x5f   :  { %v1110_v38 = vrot.slane %v2005_v18, %v2003_v33  ;;  %v1114_v43 = vrot.slane %v2005_v18, %v2008_v36 }
  0xf3   :  { %v146_v17 = vpop.f32.mrf.mxu0 }
  0xf5   :  { %v148_v19 = vpop.f32.mrf.mxu0 }
  0xf6   :  { %v248_v20 = vpop.f32.mrf.mxu1 }
  0xf7   :  { %v249_v24 = vadd.f32 %v248_v20, %v146_v17  ;;  %v1776_v17 = vmov 2131351028   ;;  %v1777_v20 = vmov 2102212464  }
  0xf8   :  { %v250_v22 = vpop.f32.mrf.mxu1 }
  0xf9   :  { %v333_v23 = vpop.f32.mrf.mxu0  ;;  %v251_v25 = vadd.f32 %v250_v22, %v148_v19  ;;  %v1778_v22 = vmov 920167782  }
  0xfa   :  { %v334_v28 = vadd.f32 %v333_v23, %v249_v24 }
  0xfb   :  { %v335_v27 = vpop.f32.mrf.mxu0 }
  0xfc   :  { %v336_v30 = vadd.f32 %v335_v27, %v251_v25 }
  0xfe   :  { %v413_v0 = vpop.f32.mrf.mxu1 }
  0xff   :  { %v414_v31 = vadd.f32 %v413_v0, %v334_v28 }
 0x100   :  { %v415_v29 = vpop.f32.mrf.mxu1 }
 0x101   :  { %v503_v32 = vpop.f32.mrf.mxu0  ;;  %v416_v34 = vadd.f32 %v415_v29, %v336_v30  ;;  %v1779_v29 = vmov 1326507024  }
 0x102   :  { %v504_v37 = vadd.f32 %v503_v32, %v414_v31 }
 0x103   :  { %v505_v35 = vpop.f32.mrf.mxu0 }
 0x104   :  { %v506_v40 = vadd.f32 %v505_v35, %v416_v34 }
 0x106   :  { %v581_v39 = vpop.f32.mrf.mxu1 }
 0x107   :  { %v2012_v41 = vadd.f32 %v581_v39, %v504_v37 }
 0x108   :  { %v583_v42 = vpop.f32.mrf.mxu1 }
 0x109   :  { %v2017_v44 = vadd.f32 %v1110_v38, %v2012_v41  ;;  %v2019_v45 = vadd.f32 %v583_v42, %v506_v40 }
 0x10a   :  { %v663_v48 = vpop.f32.mrf.mxu0 }
 0x10b   :  { %v1131_v46 = vand.u32 2147483647, %v2017_v44  ;;  %v1134_v47 = vand.u32 2139095040, %v2017_v44  ;;  %v2024_v49 = vadd.f32 %v1114_v43, %v2019_v45  ;;  %vm1133_vm13 = vcmp.lt.s32.totalorder %v2017_v44, 0 }
 0x10c   :  { %v665_v55 = vpop.f32.mrf.mxu0 }
 0x10d   :  { %v1135_v50 = vshrl.u32 %v1134_v47, 23  ;;  %v1138_v51 = vand.u32 8388607, %v1131_v46  ;;  %v1235_v52 = vand.u32 2147483647, %v2024_v49  ;;  %v1238_v53 = vand.u32 2139095040, %v2024_v49 }
 0x10e   :  { %v765_v56 = vpop.f32.mrf.mxu1  ;;  %vm2132_vm15 = vcmp.le.f32.partialorder %v1131_v46, 0.7853982 }
 0x10f   :  { %v1620_v54 = vadd.s32 4294967169, %v1135_v50  ;;  %v1239_v57 = vshrl.u32 %v1238_v53, 23  ;;  %v1242_v58 = vand.u32 8388607, %v1235_v52  ;;  %v1139_v60 = vor.u32 8388608, %v1138_v51 }
 0x110   :  { %v766_v63 = vadd.f32 %v765_v56, %v663_v48  ;;  %v767_v1 = vpop.f32.mrf.mxu1 }
 0x111   :  { %v1141_v59 = vadd.s32 1, %v1620_v54  ;;  %v1624_v61 = vadd.s32 4294967169, %v1239_v57  ;;  %v1243_v62 = vor.u32 8388608, %v1242_v58  ;;  %v850_v2 = vpop.f32.mrf.mxu0  ;;  %v2035_v13 = vshll.u32 %v1139_v60, 8 }
 0x112   :  { %v768_v5 = vadd.f32 %v767_v1, %v665_v55  ;;  %v2039_v15 = vadd.f32 %v850_v2, %v766_v63 }
 0x113   :  { %vm1142_vm1 = vcmp.gt.s32.totalorder %v1141_v59, 0  ;;  %v1245_v7 = vadd.s32 1, %v1624_v61  ;;  %v2037_v14 = vshll.u32 %v1243_v62, 8  ;;  %v852_v40 = vpop.f32.mrf.mxu0 }
 0x114   :  { %v1143_v3 = vsel %vm1142_vm1, %v1141_v59, 0  ;;  %v853_v58 = vadd.f32 %v852_v40, %v768_v5 }
 0x115   :  { %v1144_v8 = vshrl.u32 %v1143_v3, 5  ;;  %v1145_v4 = vand.u32 31, %v1143_v3  ;;  %vm1246_vm2 = vcmp.gt.s32.totalorder %v1245_v7, 0 }
 0x116   :  { %v1247_v35 = vsel %vm1246_vm2, %v1245_v7, 0  ;;  %vm1237_vm2 = vcmp.lt.s32.totalorder %v2024_v49, 0 }
 0x117   :  { %v1146_v6 = vsub.s32 32, %v1145_v4  ;;  %v1148_v10 = vshll.u32 %v1774_v16, %v1145_v4  ;;  %v1151_v12 = vshll.u32 %v1775_v11, %v1145_v4  ;;  %v1154_v19 = vshll.u32 %v1776_v17, %v1145_v4 }
 0x118   :  { %v1157_v21 = vshll.u32 %v1777_v20, %v1145_v4  ;;  %v1160_v23 = vshll.u32 %v1778_v22, %v1145_v4  ;;  %vm1163_vm3 = vcmp.lt.s32.totalorder %v1144_v8, 1  ;;  %vm1164_vm4 = vcmp.lt.s32.totalorder %v1144_v8, 2 }
 0x119   :  { %v1149_v24 = vshrl.u32 %v1775_v11, %v1146_v6  ;;  %v1152_v25 = vshrl.u32 %v1776_v17, %v1146_v6  ;;  %v1155_v27 = vshrl.u32 %v1777_v20, %v1146_v6  ;;  %v1147_v0 = vshrl.u32 %v1774_v16, %v1146_v6 }
 0x11a   :  { %v1158_v28 = vshrl.u32 %v1778_v22, %v1146_v6  ;;  %v1161_v30 = vshrl.u32 %v1779_v29, %v1146_v6  ;;  %vm1165_vm5 = vcmp.lt.s32.totalorder %v1144_v8, 3  ;;  %vm1166_vm6 = vcmp.lt.s32.totalorder %v1144_v8, 4 }
 0x11b   :  { %v1150_v31 = vor.u32 %v1149_v24, %v1148_v10  ;;  %v1153_v32 = vor.u32 %v1152_v25, %v1151_v12  ;;  %v1156_v34 = vor.u32 %v1155_v27, %v1154_v19  ;;  %v1249_v39 = vand.u32 31, %v1247_v35  ;;  %v930_v25 = vpop.f32.mrf.mxu1 }
 0x11c   :  { %v1159_v37 = vor.u32 %v1158_v28, %v1157_v21  ;;  %v1162_v38 = vor.u32 %v1161_v30, %v1160_v23  ;;  %v1248_v61 = vshrl.u32 %v1247_v35, 5 }
 0x11d   :  { %v1167_v42 = vsel %vm1163_vm3, %v1147_v0, %v1150_v31  ;;  %v1168_v43 = vsel %vm1166_vm6, %v1156_v34, 2102212464  ;;  %v1171_v47 = vsel %vm1163_vm3, %v1150_v31, %v1153_v32  ;;  %v1175_v48 = vsel %vm1163_vm3, %v1153_v32, %v1156_v34  ;;  %v932_v40 = vpop.f32.mrf.mxu1 }
 0x11e   :  { %v1169_v50 = vsel %vm1165_vm5, %v1153_v32, %v1168_v43  ;;  %v1172_v51 = vsel %vm1166_vm6, %v1159_v37, 920167782  ;;  %v1176_v53 = vsel %vm1166_vm6, %v1162_v38, 1326507024  ;;  %v1250_v54 = vsub.s32 32, %v1249_v39 }
 0x11f   :  { %v1170_v55 = vsel %vm1164_vm4, %v1167_v42, %v1169_v50  ;;  %v1173_v56 = vsel %vm1165_vm5, %v1156_v34, %v1172_v51  ;;  %v1177_v57 = vsel %vm1165_vm5, %v1159_v37, %v1176_v53  ;;  %v1252_v62 = vshll.u32 %v1774_v16, %v1249_v39  ;;  %v1020_v42 = vpop.f32.mrf.mxu0 }
 0x120   :  { %v1174_v59 = vsel %vm1164_vm4, %v1171_v47, %v1173_v56  ;;  %v1178_v60 = vsel %vm1164_vm4, %v1175_v48, %v1177_v57  ;;  %v1186_v7 = vmul.u32 %v2035_v13, %v1170_v55  ;;  %v1253_v4 = vshrl.u32 %v1775_v11, %v1250_v54  ;;  %v1098_v56 = vpop.f32.mrf.mxu1 }
 0x121   :  { %v2064_v63 = vmul.u32.u64.low %v2035_v13, %v1178_v60  ;;  %v2065_v1 = vmul.u32.u64.high %v2035_v13, %v1178_v60, %v2064_v63  ;;  %v2068_v2 = vmul.u32.u64.low %v2035_v13, %v1174_v59  ;;  %v2069_v3 = vmul.u32.u64.high %v2035_v13, %v1174_v59, %v2068_v2 }
 0x122   :  { %v1255_v5 = vshll.u32 %v1775_v11, %v1249_v39  ;;  %v1256_v8 = vshrl.u32 %v1776_v17, %v1250_v54  ;;  %v1258_v6 = vshll.u32 %v1776_v17, %v1249_v39  ;;  %v1259_v10 = vshrl.u32 %v1777_v20, %v1250_v54 }
 0x123   :  { %v1261_v12 = vshll.u32 %v1777_v20, %v1249_v39  ;;  %v1262_v19 = vshrl.u32 %v1778_v22, %v1250_v54  ;;  %v1254_v21 = vor.u32 %v1253_v4, %v1252_v62  ;;  %v1264_v24 = vshll.u32 %v1778_v22, %v1249_v39  ;;  %v1022_v4 = vpop.f32.mrf.mxu0 }
 0x124   :  { %v1257_v23 = vor.u32 %v1256_v8, %v1255_v5  ;;  %v1265_v13 = vshrl.u32 %v1779_v29, %v1250_v54  ;;  %vm1188_vm7 = vc.u32 %v2065_v1, %v2068_v2  ;;  %v1189_v27 = vadd.s32 1, %v2069_v3 }
 0x125   :  { %v1251_v0 = vshrl.u32 %v1774_v16, %v1250_v54  ;;  %v1260_v28 = vor.u32 %v1259_v10, %v1258_v6  ;;  %v1263_v30 = vor.u32 %v1262_v19, %v1261_v12  ;;  %vm1267_vm8 = vcmp.lt.s32.totalorder %v1248_v61, 1  ;;  %v1100_v12 = vpop.f32.mrf.mxu1 }
 0x126   :  { %v1266_v31 = vor.u32 %v1265_v13, %v1264_v24  ;;  %vm1268_vm9 = vcmp.lt.s32.totalorder %v1248_v61, 2  ;;  %v1190_v32 = vsel %vm1188_vm7, %v1189_v27, %v2069_v3  ;;  %vm1269_vm10 = vcmp.lt.s32.totalorder %v1248_v61, 3 }
 0x127   :  { %vm1270_vm11 = vcmp.lt.s32.totalorder %v1248_v61, 4  ;;  %v1275_v34 = vsel %vm1267_vm8, %v1254_v21, %v1257_v23  ;;  %v1191_v35 = vadd.s32 %v1190_v32, %v1186_v7  ;;  %v1279_v39 = vsel %vm1267_vm8, %v1257_v23, %v1260_v28 }
 0x128   :  { %v1272_v37 = vsel %vm1270_vm11, %v1260_v28, 2102212464  ;;  %v1276_v38 = vsel %vm1270_vm11, %v1263_v30, 920167782  ;;  %v1271_v43 = vsel %vm1267_vm8, %v1251_v0, %v1254_v21  ;;  %v1280_v48 = vsel %vm1270_vm11, %v1266_v31, 1326507024 }
 0x129   :  { %v1277_v47 = vsel %vm1269_vm10, %v1260_v28, %v1276_v38  ;;  %v931_v50 = vadd.f32 %v930_v25, %v2039_v15  ;;  %v1192_v51 = vadd.s32 536870912, %v1191_v35  ;;  %v1273_v53 = vsel %vm1269_vm10, %v1257_v23, %v1272_v37 }
 0x12a   :  { %v1278_v54 = vsel %vm1268_vm9, %v1275_v34, %v1277_v47  ;;  %v1281_v55 = vsel %vm1269_vm10, %v1263_v30, %v1280_v48  ;;  %v2099_v62 = vsub.s32 3, %v2000_v26  ;;  %v933_v7 = vadd.f32 %v932_v40, %v853_v58  ;;  %v1573_v30 = vld [vmem:[#allocation7 + $0x2] ss:$4 sm:$0xf] }
 0x12b   :  { %v1282_v57 = vsel %vm1268_vm9, %v1279_v39, %v1281_v55  ;;  %v2094_v59 = vmul.u32.u64.low %v2037_v14, %v1278_v54  ;;  %v2095_v60 = vmul.u32.u64.high %v2037_v14, %v1278_v54, %v2094_v59  ;;  %v1193_v63 = vshrl.u32 %v1192_v51, 30 }
 0x12c   :  { %v2102_v15 = vmul.u32.u64.low %v2037_v14, %v1282_v57  ;;  %v2103_v3 = vmul.u32.u64.high %v2037_v14, %v1282_v57, %v2102_v15  ;;  %v1274_v5 = vsel %vm1268_vm9, %v1271_v43, %v1273_v53  ;;  %v1021_v8 = vadd.f32 %v1020_v42, %v931_v50 }
 0x12d   :  { %v1118_v6 = vrot.slane %v2005_v18, %v2033_v9  ;;  %v1194_v10 = vshll.u32 %v1193_v63, 30  ;;  %v1293_v19 = vadd.s32 1, %v2095_v60  ;;  %v1023_v21 = vadd.f32 %v1022_v4, %v933_v7 }
 0x12e   :  { %v2109_v26 = vadd.f32 %v1098_v56, %v1021_v8  ;;  %v1290_v24 = vmul.u32 %v2037_v14, %v1274_v5  ;;  %vm1292_vm12 = vc.u32 %v2103_v3, %v2094_v59  ;;  %v1122_v58 = vrot.slane %v2005_v18, %v2099_v62 }
 0x12f   :  { %v1195_v23 = vsub.s32 %v1191_v35, %v1194_v10  ;;  %v1217_v61 = vsub.s32 4, %v1193_v63  ;;  %v1294_v13 = vsel %vm1292_vm12, %v1293_v19, %v2095_v60  ;;  %v2120_v27 = vadd.f32 %v1100_v12, %v1023_v21 }
 0x130   :  { %v2118_v25 = vadd.f32 %v1118_v6, %v2109_v26  ;;  %v1295_v28 = vadd.s32 %v1294_v13, %v1290_v24  ;;  %vm1574_vm14 = vcmp.gt.f32.partialorder %v1573_v30, 0.5  ;;  %v1780_v51 = vmov 0  }
 0x131   :  { %v1197_v0 = vsub.s32 0, %v1195_v23  ;;  %v2126_v18 = vadd.f32 %v1122_v58, %v2120_v27  ;;  %v1218_v35 = vsel %vm1133_vm13, %v1217_v61, %v1193_v63  ;;  %v2141_v53 = vsel %vm1574_vm14, 1, %v1780_v51 }
 0x132   :  { %v1342_v14 = vand.u32 2139095040, %v2118_v25  ;;  %v1296_v32 = vadd.s32 536870912, %v1295_v28  ;;  %v1339_v34 = vand.u32 2147483647, %v2118_v25  ;;  %v1220_v47 = vsel %vm2132_vm15, 0, %v1218_v35 }
 0x133   :  { %v1621_v31 = vmin.u32 %v1197_v0, %v1195_v23  ;;  %v1446_v50 = vand.u32 2139095040, %v2126_v18  ;;  %v1187_v56 = vadd.s32 %v2068_v2, %v2065_v1  ;;  %v1224_v63 = vadd.s32 3, %v1220_v47 }
 0x134   :  { %v1343_v37 = vshrl.u32 %v1342_v14, 23  ;;  %v1297_v40 = vshrl.u32 %v1296_v32, 30  ;;  %v1346_v48 = vand.u32 8388607, %v1339_v34  ;;  %v1443_v8 = vand.u32 2147483647, %v2126_v18 }
 0x135   :  { %v1199_v38 = vclz %v1621_v31  ;;  %v1447_v57 = vshrl.u32 %v1446_v50, 23  ;;  %v2154_v58 = vand.u32 3, %v1224_v63  ;;  %vm2158_vm4 = vcmp.le.f32.partialorder %v1235_v52, 0.7853982 }
 0x136   :  { %v1628_v42 = vadd.s32 4294967169, %v1343_v37  ;;  %v1298_v54 = vshll.u32 %v1297_v40, 30  ;;  %v1321_v55 = vsub.s32 4, %v1297_v40  ;;  %v1347_v5 = vor.u32 8388608, %v1346_v48 }
 0x137   :  { %v1622_v43 = vadd.s32 4294967294, %v1199_v38  ;;  %v1632_v24 = vadd.s32 4294967169, %v1447_v57  ;;  %v2172_v52 = vand.u32 8388607, %v1443_v8  ;;  %vm1230_vm11 = vcmp.eq.s32.totalorder %v2154_v58, 2 }
 0x138   :  { %v1349_v46 = vadd.s32 1, %v1628_v42  ;;  %v2146_v15 = vsub.s32 %v1295_v28, %v1298_v54  ;;  %v2152_v1 = vsel %vm1237_vm2, %v1321_v55, %v1297_v40  ;;  %v2165_v14 = vshll.u32 %v1347_v5, 8 }
 0x139   :  { %vm1623_vm1 = vcmp.lt.s32.totalorder %v1622_v43, 0  ;;  %v1324_v32 = vsel %vm2158_vm4, 0, %v2152_v1  ;;  %vm1227_vm12 = vcmp.eq.s32.totalorder %v2154_v58, 0  ;;  %vm1226_vm14 = vcmp.lt.s32.totalorder %v2154_v58, 2 }
 0x13a   :  { %v1202_v60 = vsel %vm1623_vm1, 0, %v1622_v43  ;;  %vm1350_vm3 = vcmp.gt.s32.totalorder %v1349_v46, 0  ;;  %v1301_v10 = vsub.s32 0, %v2146_v15  ;;  %vm1223_vm1 = vweird.f32 %v2017_v44 }
 0x13b   :  { %v1203_v7 = vsub.s32 32, %v1202_v60  ;;  %v1207_v4 = vsub.s32 4294967266, %v1202_v60  ;;  %v1204_v6 = vshll.u32 %v1195_v23, %v1202_v60  ;;  %v1351_v2 = vsel %vm1350_vm3, %v1349_v46, 0 }
 0x13c   :  { %v1353_v21 = vand.u32 31, %v1351_v2  ;;  %v1291_v23 = vadd.s32 %v2094_v59, %v2103_v3  ;;  %v1625_v13 = vmin.u32 %v1301_v10, %v2146_v15  ;;  %v1352_v35 = vshrl.u32 %v1351_v2, 5 }
 0x13d   :  { %v1205_v12 = vshrl.u32 %v1187_v56, %v1203_v7  ;;  %v1208_v19 = vadd.s32 127, %v1207_v4  ;;  %v1453_v3 = vadd.s32 1, %v1632_v24 }
 0x13e   :  { %v1354_v30 = vsub.s32 32, %v1353_v21  ;;  %v1303_v31 = vclz %v1625_v13  ;;  %v1356_v59 = vshll.u32 %v1774_v16, %v1353_v21  ;;  %v1359_v50 = vshll.u32 %v1775_v11, %v1353_v21 }
 0x13f   :  { %v1206_v0 = vor.u32 %v1205_v12, %v1204_v6  ;;  %v1209_v28 = vshll.u32 %v1208_v19, 23  ;;  %v1362_v51 = vshll.u32 %v1776_v17, %v1353_v21  ;;  %v1365_v55 = vshll.u32 %v1777_v20, %v1353_v21 }
 0x140   :  { %v1626_v40 = vadd.s32 4294967294, %v1303_v31  ;;  %v1355_v42 = vshrl.u32 %v1774_v16, %v1354_v30  ;;  %v1357_v43 = vshrl.u32 %v1775_v11, %v1354_v30  ;;  %v1360_v47 = vshrl.u32 %v1776_v17, %v1354_v30 }
 0x141   :  { %v1210_v37 = vor.u32 4788187, %v1209_v28  ;;  %v1213_v38 = vcvt.s32.f32 %v1206_v0  ;;  %v1363_v54 = vshrl.u32 %v1777_v20, %v1354_v30  ;;  %v1366_v46 = vshrl.u32 %v1778_v22, %v1354_v30 }
 0x142   :  { %vm1627_vm5 = vcmp.lt.s32.totalorder %v1626_v40, 0  ;;  %v1368_v56 = vshll.u32 %v1778_v22, %v1353_v21  ;;  %v1369_v7 = vshrl.u32 %v1779_v29, %v1354_v30  ;;  %v1358_v6 = vor.u32 %v1357_v43, %v1356_v59 }
 0x143   :  { %v1211_v48 = vand.u32 2147483647, %v1210_v37  ;;  %v1306_v60 = vsel %vm1627_vm5, 0, %v1626_v40  ;;  %v1364_v63 = vor.u32 %v1363_v54, %v1362_v51  ;;  %v1361_v10 = vor.u32 %v1360_v47, %v1359_v50  ;;  %v2200_v51 = vld [vmem:[#allocation7 + $0x1] ss:$4 sm:$0xf] }
 0x144   :  { %v1307_v4 = vsub.s32 32, %v1306_v60  ;;  %v1311_v5 = vsub.s32 4294967266, %v1306_v60  ;;  %v1308_v12 = vshll.u32 %v2146_v15, %v1306_v60  ;;  %v1367_v19 = vor.u32 %v1366_v46, %v1365_v55 }
 0x145   :  { %v1214_v57 = vmul.f32 %v1213_v38, %v1211_v48  ;;  %v1370_v24 = vor.u32 %v1369_v7, %v1368_v56  ;;  %vm1371_vm6 = vcmp.lt.s32.totalorder %v1352_v35, 1  ;;  %vm1374_vm7 = vcmp.lt.s32.totalorder %v1352_v35, 4 }
 0x146   :  { %v1309_v13 = vshrl.u32 %v1291_v23, %v1307_v4  ;;  %v1312_v0 = vadd.s32 127, %v1311_v5  ;;  %vm1372_vm8 = vcmp.lt.s32.totalorder %v1352_v35, 2  ;;  %vm1373_vm9 = vcmp.lt.s32.totalorder %v1352_v35, 3 }
 0x147   :  { %v1215_v2 = vxor.u32 2147483648, %v1214_v57  ;;  %v1376_v28 = vsel %vm1374_vm7, %v1364_v63, 2102212464  ;;  %v1379_v15 = vsel %vm1371_vm6, %v1358_v6, %v1361_v10  ;;  %v1375_v23 = vsel %vm1371_vm6, %v1355_v42, %v1358_v6 }
 0x148   :  { %v1310_v31 = vor.u32 %v1309_v13, %v1308_v12  ;;  %v1313_v37 = vshll.u32 %v1312_v0, 23  ;;  %v1377_v38 = vsel %vm1373_vm9, %v1361_v10, %v1376_v28  ;;  %v1380_v59 = vsel %vm1374_vm7, %v1367_v19, 920167782 }
 0x149   :  { %v1216_v21 = vsel %vm1133_vm13, %v1215_v2, %v1214_v57  ;;  %v1381_v43 = vsel %vm1373_vm9, %v1364_v63, %v1380_v59  ;;  %v1383_v47 = vsel %vm1371_vm6, %v1361_v10, %v1364_v63  ;;  %v1384_v50 = vsel %vm1374_vm7, %v1370_v24, 1326507024 }
 0x14a   :  { %v1219_v30 = vsel %vm2132_vm15, %v2017_v44, %v1216_v21  ;;  %v1314_v40 = vor.u32 4788187, %v1313_v37  ;;  %v1317_v48 = vcvt.s32.f32 %v1310_v31  ;;  %v1382_v39 = vsel %vm1372_vm8, %v1379_v15, %v1381_v43 }
 0x14b   :  { %1666 = vcosq.f32 %v1219_v30  ;;  %vm1454_vm10 = vcmp.gt.s32.totalorder %v1453_v3, 0  ;;  %v1385_v42 = vsel %vm1373_vm9, %v1367_v19, %v1384_v50  ;;  %v1378_v56 = vsel %vm1372_vm8, %v1375_v23, %v1377_v38 }
 0x14c   :  { %1668 = vsinq.f32 %v1219_v30  ;;  %v1315_v54 = vand.u32 2147483647, %v1314_v40  ;;  %v2204_v55 = vmul.u32.u64.low %v2165_v14, %v1382_v39  ;;  %v2205_v46 = vmul.u32.u64.high %v2165_v14, %v1382_v39, %v2204_v55 }
 0x14d   :  { %v1386_v57 = vsel %vm1372_vm8, %v1383_v47, %v1385_v42  ;;  %v1455_v60 = vsel %vm1454_vm10, %v1453_v3, 0  ;;  %v1551_v6 = vrot.slane %v2200_v51, %v2003_v33  ;;  %v1579_v10 = vrot.slane %v2141_v53, %v2003_v33 }
 0x14e   :  { %v1318_v63 = vmul.f32 %v1317_v48, %v1315_v54  ;;  %v2211_v7 = vmul.u32.u64.low %v2165_v14, %v1386_v57  ;;  %v2212_v4 = vmul.u32.u64.high %v2165_v14, %v1386_v57, %v2211_v7  ;;  %v2214_v5 = vshrl.u32 %v1455_v60, 5 }
 0x14f   :  { %v2224_v35 = vadd.s32 3, %v1324_v32  ;;  %v1457_v3 = vand.u32 31, %v1455_v60  ;;  %v1394_v12 = vmul.u32 %v2165_v14, %v1378_v56  ;;  %v1397_v19 = vadd.s32 1, %v2205_v46 }
 0x150   :  { %v1319_v2 = vxor.u32 2147483648, %v1318_v63  ;;  %v1451_v24 = vor.u32 8388608, %v2172_v52  ;;  %vm1475_vm13 = vcmp.lt.s32.totalorder %v2214_v5, 1  ;;  %vm1396_vm15 = vc.u32 %v2212_v4, %v2204_v55 }
 0x151   :  { %v1458_v13 = vsub.s32 32, %v1457_v3  ;;  %v1460_v0 = vshll.u32 %v1774_v16, %v1457_v3  ;;  %v1463_v21 = vshll.u32 %v1775_v11, %v1457_v3  ;;  %v1466_v14 = vshll.u32 %v1776_v17, %v1457_v3 }
 0x152   :  { %v1320_v1 = vsel %vm1237_vm2, %v1319_v2, %v1318_v63  ;;  %v1469_v32 = vshll.u32 %v1777_v20, %v1457_v3  ;;  %v1398_v28 = vsel %vm1396_vm15, %v1397_v19, %v2205_v46  ;;  %v1472_v40 = vshll.u32 %v1778_v22, %v1457_v3 }
 0x153   :  { %v1323_v52 = vsel %vm2158_vm4, %v2024_v49, %v1320_v1  ;;  %v1459_v30 = vshrl.u32 %v1774_v16, %v1458_v13  ;;  %v1461_v31 = vshrl.u32 %v1775_v11, %v1458_v13  ;;  %v1399_v37 = vadd.s32 %v1398_v28, %v1394_v12 }
 0x154   :  { %1670 = vcosq.f32 %v1323_v52  ;;  %v1464_v15 = vshrl.u32 %v1776_v17, %v1458_v13  ;;  %v1467_v23 = vshrl.u32 %v1777_v20, %v1458_v13  ;;  %v1470_v59 = vshrl.u32 %v1778_v22, %v1458_v13 }
 0x155   :  { %1672 = vsinq.f32 %v1323_v52  ;;  %v1462_v38 = vor.u32 %v1461_v31, %v1460_v0  ;;  %v1400_v43 = vadd.s32 536870912, %v1399_v37  ;;  %v1473_v16 = vshrl.u32 %v1779_v29, %v1458_v13 }
 0x156   :  { %v1465_v47 = vor.u32 %v1464_v15, %v1463_v21  ;;  %v1468_v48 = vor.u32 %v1467_v23, %v1466_v14  ;;  %v1471_v50 = vor.u32 %v1470_v59, %v1469_v32  ;;  %vm1477_vm2 = vcmp.lt.s32.totalorder %v2214_v5, 3 }
 0x157   :  { %vm1478_vm3 = vcmp.lt.s32.totalorder %v2214_v5, 4  ;;  %v2255_v20 = vshrl.u32 %v1400_v43, 30  ;;  %v1474_v54 = vor.u32 %v1473_v16, %v1472_v40  ;;  %v1479_v22 = vsel %vm1475_vm13, %v1459_v30, %v1462_v38 }
 0x158   :  { %v1667_v61 = vpop.eup %1666  ;;  %v1480_v29 = vsel %vm1478_vm3, %v1468_v48, 2102212464  ;;  %v1483_v46 = vsel %vm1475_vm13, %v1462_v38, %v1465_v47  ;;  %v1484_v56 = vsel %vm1478_vm3, %v1471_v50, 920167782  ;;  %vm1476_vm4 = vcmp.lt.s32.totalorder %v2214_v5, 2 }
 0x159   :  { %v1669_v39 = vpop.eup %1668  ;;  %v1231_v11 = vxor.u32 2147483648, %v1667_v61  ;;  %v1402_v60 = vshll.u32 %v2255_v20, 30  ;;  %v1481_v63 = vsel %vm1477_vm2, %v1465_v47, %v1480_v29  ;;  %v1485_v2 = vsel %vm1477_vm2, %v1468_v48, %v1484_v56 }
 0x15a   :  { %v1228_v17 = vxor.u32 2147483648, %v1669_v39  ;;  %v1482_v3 = vsel %vm1476_vm4, %v1479_v22, %v1481_v63  ;;  %v1487_v12 = vsel %vm1475_vm13, %v1465_v47, %v1468_v48  ;;  %vm1592_vm5 = vcmp.eq.s32.totalorder %v1579_v10, 1 }
 0x15b   :  { %v1232_v42 = vsel %vm1230_vm11, %v1231_v11, %v1669_v39  ;;  %v1403_v13 = vsub.s32 %v1399_v37, %v1402_v60  ;;  %v1486_v0 = vsel %vm1476_vm4, %v1483_v46, %v1485_v2  ;;  %v1488_v21 = vsel %vm1478_vm3, %v1474_v54, 1326507024 }
 0x15c   :  { %v1229_v57 = vsel %vm1227_vm12, %v1667_v61, %v1228_v17  ;;  %v1491_v1 = vshll.u32 %v1451_v24, 8  ;;  %v1329_v14 = vand.u32 3, %v2224_v35  ;;  %v1489_v44 = vsel %vm1477_vm2, %v1471_v50, %v1488_v21 }
 0x15d   :  { %v1233_v7 = vsel %vm1226_vm14, %v1229_v57, %v1232_v42  ;;  %v1405_v32 = vsub.s32 0, %v1403_v13  ;;  %v1490_v52 = vsel %vm1476_vm4, %v1487_v12, %v1489_v44  ;;  %v1555_v35 = vrot.slane %v2200_v51, %v2008_v36 }
 0x15e   :  { %v1234_v19 = vsel %vm1223_vm1, nan, %v1233_v7  ;;  %v2296_v28 = vmul.u32.u64.low %v1491_v1, %v1486_v0  ;;  %v2297_v30 = vmul.u32.u64.high %v1491_v1, %v1486_v0, %v2296_v28  ;;  %vm1331_vm6 = vcmp.eq.s32.totalorder %v1329_v14, 0 }
 0x15f   :  { %v1568_v58 = vmul.f32 %v1551_v6, %v1234_v19  ;;  %v1629_v33 = vmin.u32 %v1405_v32, %v1403_v13  ;;  %v2299_v6 = vmul.u32.u64.low %v1491_v1, %v1490_v52  ;;  %v2300_v31 = vmul.u32.u64.high %v1491_v1, %v1490_v52, %v2299_v6 }
 0x160   :  { %vm1334_vm7 = vcmp.eq.s32.totalorder %v1329_v14, 2  ;;  %v1498_v38 = vmul.u32 %v1491_v1, %v1482_v3  ;;  %v1501_v59 = vadd.s32 1, %v2297_v30  ;;  %vm1330_vm9 = vcmp.lt.s32.totalorder %v1329_v14, 2 }
 0x161   :  { %v1596_v10 = vsel %vm1592_vm5, %v2012_v41, %v1568_v58  ;;  %v1671_v24 = vpop.eup %1670  ;;  %v1583_v41 = vrot.slane %v2141_v53, %v2008_v36  ;;  %v1407_v5 = vclz %v1629_v33  ;;  %v1499_v43 = vadd.s32 %v2296_v28, %v2300_v31 }
 0x162   :  { %1600 = vst [vmem:[#allocation8] sm:$0xff] %v1596_v10  ;;  %v1673_v37 = vpop.eup %1672  ;;  %v1335_v15 = vxor.u32 2147483648, %v1671_v24  ;;  %vm1500_vm8 = vc.u32 %v2300_v31, %v2296_v28  ;;  %vm1327_vm10 = vweird.f32 %v2024_v49  ;;  %v1395_v17 = vadd.s32 %v2204_v55, %v2212_v4 }
 0x163   :  { %v1332_v23 = vxor.u32 2147483648, %v1673_v37  ;;  %v1630_v61 = vadd.s32 4294967294, %v1407_v5  ;;  %v1502_v48 = vsel %vm1500_vm8, %v1501_v59, %v2297_v30  ;;  %vm1593_vm12 = vcmp.eq.s32.totalorder %v1583_v41, 1 }
 0x164   :  { %v1336_v40 = vsel %vm1334_vm7, %v1335_v15, %v1673_v37  ;;  %v1503_v36 = vadd.s32 %v1502_v48, %v1498_v38  ;;  %vm1341_vm13 = vcmp.lt.s32.totalorder %v2118_v25, 0  ;;  %vm1340_vm14 = vcmp.le.f32.partialorder %v1339_v34, 0.7853982 }
 0x165   :  { %v1333_v47 = vsel %vm1331_vm6, %v1671_v24, %v1332_v23  ;;  %vm1631_vm11 = vcmp.lt.s32.totalorder %v1630_v61, 0  ;;  %v1559_v59 = vrot.slane %v2200_v51, %v2033_v9  ;;  %vm1445_vm3 = vcmp.lt.s32.totalorder %v2126_v18, 0 }
 0x166   :  { %v1337_v16 = vsel %vm1330_vm9, %v1333_v47, %v1336_v40  ;;  %v1410_v11 = vsel %vm1631_vm11, 0, %v1630_v61  ;;  %v1504_v42 = vadd.s32 536870912, %v1503_v36  ;;  %v1587_v61 = vrot.slane %v2141_v53, %v2033_v9 }
 0x167   :  { %v1338_v39 = vsel %vm1327_vm10, nan, %v1337_v16  ;;  %v1411_v54 = vsub.s32 32, %v1410_v11  ;;  %v1415_v22 = vsub.s32 4294967266, %v1410_v11  ;;  %v1412_v46 = vshll.u32 %v1403_v13, %v1410_v11 }
 0x168   :  { %v1569_v50 = vmul.f32 %v1555_v35, %v1338_v39  ;;  %v1505_v49 = vshrl.u32 %v1504_v42, 30  ;;  %vm1444_vm5 = vcmp.le.f32.partialorder %v1443_v8, 0.7853982  ;;  %vm1431_vm6 = vweird.f32 %v2118_v25 }
 0x169   :  { %v1413_v56 = vshrl.u32 %v1395_v17, %v1411_v54  ;;  %v1416_v57 = vadd.s32 127, %v1415_v22  ;;  %vm1594_vm7 = vcmp.eq.s32.totalorder %v1587_v61, 1  ;;  %vm1535_vm11 = vweird.f32 %v2126_v18 }
 0x16a   :  { %v1597_v29 = vsel %vm1593_vm12, %v2019_v45, %v1569_v50  ;;  %v1506_v7 = vshll.u32 %v1505_v49, 30  ;;  %v1425_v45 = vsub.s32 4, %v2255_v20  ;;  %v1529_v48 = vsub.s32 4, %v1505_v49 }
 0x16b   :  { %1601 = vst [vmem:[#allocation8 + $0x8] sm:$0xff] %v1597_v29  ;;  %v1414_v60 = vor.u32 %v1413_v56, %v1412_v46  ;;  %v1417_v63 = vshll.u32 %v1416_v57, 23 }
 0x16c   :  { %v1507_v2 = vsub.s32 %v1503_v36, %v1506_v7  ;;  %v1426_v32 = vsel %vm1341_vm13, %v1425_v45, %v2255_v20  ;;  %v1530_v17 = vsel %vm1445_vm3, %v1529_v48, %v1505_v49  ;;  %v1563_v49 = vrot.slane %v2200_v51, %v2099_v62 }
 0x16d   :  { %v1418_v3 = vor.u32 4788187, %v1417_v63  ;;  %v1421_v19 = vcvt.s32.f32 %v1414_v60  ;;  %v1428_v28 = vsel %vm1340_vm14, 0, %v1426_v32  ;;  %v1532_v22 = vsel %vm1444_vm5, 0, %v1530_v17 }
 0x16e   :  { %v1509_v0 = vsub.s32 0, %v1507_v2  ;;  %v1432_v31 = vadd.s32 3, %v1428_v28  ;;  %v1536_v42 = vadd.s32 3, %v1532_v22 }
 0x16f   :  { %v1419_v12 = vand.u32 2147483647, %v1418_v3 }
 0x170   :  { %v1633_v55 = vmin.u32 %v1509_v0, %v1507_v2  ;;  %v1433_v37 = vand.u32 3, %v1432_v31  ;;  %v1537_v29 = vand.u32 3, %v1536_v42 }
 0x171   :  { %v1422_v58 = vmul.f32 %v1421_v19, %v1419_v12 }
 0x172   :  { %v1511_v13 = vclz %v1633_v55  ;;  %vm1438_vm1 = vcmp.eq.s32.totalorder %v1433_v37, 2  ;;  %vm1435_vm2 = vcmp.eq.s32.totalorder %v1433_v37, 0  ;;  %vm1434_vm4 = vcmp.lt.s32.totalorder %v1433_v37, 2 }
 0x173   :  { %v1423_v4 = vxor.u32 2147483648, %v1422_v58  ;;  %vm1542_vm8 = vcmp.eq.s32.totalorder %v1537_v29, 2  ;;  %vm1539_vm9 = vcmp.eq.s32.totalorder %v1537_v29, 0  ;;  %vm1538_vm10 = vcmp.lt.s32.totalorder %v1537_v29, 2 }
 0x174   :  { %v1634_v14 = vadd.s32 4294967294, %v1511_v13 }
 0x175   :  { %v1424_v21 = vsel %vm1341_vm13, %v1423_v4, %v1422_v58 }
 0x176   :  { %v1427_v1 = vsel %vm1340_vm14, %v2118_v25, %v1424_v21  ;;  %vm1635_vm15 = vcmp.lt.s32.totalorder %v1634_v14, 0  ;;  %v1591_v25 = vrot.slane %v2141_v53, %v2099_v62 }
 0x177   :  { %1674 = vcosq.f32 %v1427_v1  ;;  %v1514_v44 = vsel %vm1635_vm15, 0, %v1634_v14 }
 0x178   :  { %1676 = vsinq.f32 %v1427_v1  ;;  %v1515_v10 = vsub.s32 32, %v1514_v44  ;;  %v1519_v52 = vsub.s32 4294967266, %v1514_v44  ;;  %v1516_v30 = vshll.u32 %v1507_v2, %v1514_v44 }
 0x179   :  { %vm1595_vm12 = vcmp.eq.s32.totalorder %v1591_v25, 1 }
 0x17a   :  { %v1517_v33 = vshrl.u32 %v1499_v43, %v1515_v10  ;;  %v1520_v6 = vadd.s32 127, %v1519_v52 }
 0x17c   :  { %v1518_v24 = vor.u32 %v1517_v33, %v1516_v30  ;;  %v1521_v35 = vshll.u32 %v1520_v6, 23 }
 0x17e   :  { %v1522_v34 = vor.u32 4788187, %v1521_v35  ;;  %v1525_v41 = vcvt.s32.f32 %v1518_v24 }
 0x180   :  { %v1523_v15 = vand.u32 2147483647, %v1522_v34 }
 0x182   :  { %v1526_v23 = vmul.f32 %v1525_v41, %v1523_v15 }
 0x184   :  { %v1675_v5 = vpop.eup %1674  ;;  %v1527_v43 = vxor.u32 2147483648, %v1526_v23 }
 0x185   :  { %v1677_v38 = vpop.eup %1676  ;;  %v1439_v20 = vxor.u32 2147483648, %v1675_v5 }
 0x186   :  { %v1436_v40 = vxor.u32 2147483648, %v1677_v38  ;;  %v1528_v36 = vsel %vm1445_vm3, %v1527_v43, %v1526_v23 }
 0x187   :  { %v1440_v47 = vsel %vm1438_vm1, %v1439_v20, %v1677_v38  ;;  %v1531_v11 = vsel %vm1444_vm5, %v2126_v18, %v1528_v36 }
 0x188   :  { %v1437_v16 = vsel %vm1435_vm2, %v1675_v5, %v1436_v40  ;;  %1678 = vcosq.f32 %v1531_v11 }
 0x189   :  { %v1441_v39 = vsel %vm1434_vm4, %v1437_v16, %v1440_v47  ;;  %1680 = vsinq.f32 %v1531_v11 }
 0x18a   :  { %v1442_v50 = vsel %vm1431_vm6, nan, %v1441_v39 }
 0x18b   :  { %v1570_v9 = vmul.f32 %v1559_v59, %v1442_v50 }
 0x18d   :  { %v1598_v54 = vsel %vm1594_vm7, %v2109_v26, %v1570_v9 }
 0x18e   :  { %1602 = vst [vmem:[#allocation8 + $0x10] sm:$0xff] %v1598_v54 }
 0x195   :  { %v1679_v46 = vpop.eup %1678 }
 0x196   :  { %v1681_v8 = vpop.eup %1680  ;;  %v1543_v56 = vxor.u32 2147483648, %v1679_v46 }
 0x197   :  { %v1540_v57 = vxor.u32 2147483648, %v1681_v8 }
 0x198   :  { %v1544_v60 = vsel %vm1542_vm8, %v1543_v56, %v1681_v8 }
 0x199   :  { %v1541_v63 = vsel %vm1539_vm9, %v1679_v46, %v1540_v57 }
 0x19a   :  { %v1545_v26 = vsel %vm1538_vm10, %v1541_v63, %v1544_v60 }
 0x19b   :  { %v1546_v7 = vsel %vm1535_vm11, nan, %v1545_v26 }
 0x19c   :  { %v1571_v3 = vmul.f32 %v1563_v49, %v1546_v7 }
 0x19e   :  { %v1599_v2 = vsel %vm1595_vm12, %v2120_v27, %v1571_v3 }
 0x19f   :  { %1603 = vst.msk [vmem:[#allocation8 + $0x18] sm:$0xff] %vm65_vm0, %v1599_v2 }
 0x1a0   :  { %1753 = shalt.err (!%p1750_p5)
}
 0x1a1   :  { %1613 = dma.vmem_to_hbm [thread:$0]  %s1611_s2, 512, %s2343_s3, [#allocation4]  }
 0x1a2   :  { %1766 = dma.done.wait [#allocation4], 512  }
 0x1a3   :  { %1767 = vsyncadd [#allocation4], 4294966784 }
 0x1a4   :  { %1617 = vsyncpa [#allocation3], 1 }
 0x1a5   :  { %1618 = vsyncpa [#allocation6], 1 }
 0x1a6   :  { %1619 = vsyncpa [#allocation4], 1 }

</bundles_post_ra>
